<compile_context>
chip_gen: v7x
topology: tpu7x:2x2x1
jax: 0.10.0
libtpu: 0.0.40
codegen_flags: <defaults>
</compile_context>

<pallas_src>
from itertools import combinations, combinations_with_replacement

import jax
import jax.numpy as jnp
from jax import lax
from jax.experimental import pallas as pl
from jax.experimental.pallas import tpu as pltpu


# --------------------------------------------------------------------------
# In-kernel helpers
# --------------------------------------------------------------------------
def _l2_normalize(x, eps=1e-12):
    # F.normalize: x / max(||x||, eps)  ==  x * rsqrt(max(sum(x^2), eps^2))  (EUP rsqrt)
    ssq = jnp.sum(x * x, axis=-1, keepdims=True)
    return x * lax.rsqrt(jnp.maximum(ssq, eps * eps))


# --------------------------------------------------------------------------
# Fused forward kernel (one batch-block per grid step)
# --------------------------------------------------------------------------
def make_fused_kernel(n_utils, E, layout):
    col_off, width = layout["col_off"], layout["width"]
    o_u, o_sx, o_sy = layout["o_u"], layout["o_sx"], layout["o_sy"]
    o_cx, o_cy = layout["o_cx"], layout["o_cy"]
    s_br, s_r = layout["s_br"], layout["s_r"]

    def kernel(scal, *refs):
        x_refs = refs[:n_utils]                # each (Bb, N_i, E) VMEM block
        w_ref = refs[n_utils]                  # (E, total_cols) concatenated weights
        b_ref = refs[n_utils + 1]              # (1, total_cols) concatenated biases
        wr_ref = refs[n_utils + 2]             # (1, n*E) feature-reduce rows
        o_ref = refs[n_utils + 3]              # (1, Bb, n*E) merged output block

        xs, slabs = [], []
        # ---- one concatenated embedding matmul per utility (all potentials' conv1x1) ----
        for i in range(n_utils):
            x = x_refs[i][...]                                        # (Bb, N_i, E)
            Bb, Ni = x.shape[0], x.shape[1]
            xs.append(x)
            x2 = x.reshape(Bb * Ni, E)
            w_i = w_ref[:, col_off[i]:col_off[i] + width[i]]          # (E, P_i*E) lane-dense
            s = jnp.dot(x2, w_i, preferred_element_type=jnp.float32)
            s = s + b_ref[:, col_off[i]:col_off[i] + width[i]]
            slabs.append(s.reshape(Bb, Ni, width[i]))                 # (Bb, N_i, P_i*E)

        factors = {i: [] for i in range(n_utils)}                     # (Bb, N_i, 1) columns

        # ---- unary + self potentials ----
        for i in range(n_utils):
            slab = slabs[i]
            # Unary: relu(conv(x)); feature-reduce as a VPU multiply + lane reduce.
            xr = jnp.maximum(slab[:, :, o_u[i]:o_u[i] + E], 0.0)
            # TODO(synk): reference applies F.dropout with training=True (a known bug);
            # treated as identity (inference semantics) here.
            wr_i = wr_ref[:, i * E:(i + 1) * E]                       # (1, E)
            u = jnp.sum(xr * wr_i, axis=-1, keepdims=True) + scal[s_br[i]]
            factors[i].append(u)                                      # (Bb, N_i, 1)

            # Self interaction: mean_m(xn . yn[m]) == xn . mean_m(yn)  (no NxN matmul)
            xn = _l2_normalize(slab[:, :, o_sx[i]:o_sx[i] + E])
            yn = _l2_normalize(slab[:, :, o_sy[i]:o_sy[i] + E])
            ybar = jnp.mean(yn, axis=1, keepdims=True)                # (Bb, 1, E)
            factors[i].append(jnp.sum(xn * ybar, axis=-1, keepdims=True))

        # ---- cross-utility pairwise potentials (matmul-of-the-mean, both directions) ----
        for i, j in combinations(range(n_utils), 2):
            xn = _l2_normalize(slabs[i][:, :, o_cx[(i, j)]:o_cx[(i, j)] + E])
            yn = _l2_normalize(slabs[j][:, :, o_cy[(i, j)]:o_cy[(i, j)] + E])
            ybar = jnp.mean(yn, axis=1, keepdims=True)                # (Bb, 1, E)
            xbar = jnp.mean(xn, axis=1, keepdims=True)                # (Bb, 1, E)
            factors[i].append(jnp.sum(xn * ybar, axis=-1, keepdims=True))
            factors[j].append(jnp.sum(yn * xbar, axis=-1, keepdims=True))

        # ---- reduce potentials -> softmax over spatial -> attend (all VPU/XLU/EUP) ----
        outs = []
        for i in range(n_utils):
            scores = factors[i][0] * scal[s_r[i]]
            for p in range(1, len(factors[i])):
                scores = scores + factors[i][p] * scal[s_r[i] + p]    # (Bb, N_i, 1)
            m = jnp.max(scores, axis=1, keepdims=True)
            e = jnp.exp(scores - m)
            denom = jnp.sum(e, axis=1, keepdims=True)
            p_att = e * pl.reciprocal(denom, approx=True)
            outs.append(jnp.sum(p_att * xs[i], axis=1))               # (Bb, E)

        # Single lane-dense store of all utilities' outputs.
        o_ref[0] = jnp.concatenate(outs, axis=-1)                     # (Bb, n*E)

    return kernel


# --------------------------------------------------------------------------
# Atten module (parameters built deterministically in-script)
# --------------------------------------------------------------------------
class AttenPallas:
    def __init__(self, util_e, key):
        self.util_e = list(util_e)
        self.n_utils = n = len(util_e)
        if n > 1:
            # The reference cross-pair code path (sizes=None) requires equal embed dims.
            assert all(e == util_e[0] for e in util_e)
        self.E = E = util_e[0]

        keys = iter(jax.random.split(key, 4 * n * n + 16))

        def nrm(shape, scale=0.1):
            return (scale * jax.random.normal(next(keys), shape)).astype(jnp.float32)

        # Raw parameters in PyTorch layout (Conv1d weight = (out, in)).
        self.unary = [dict(W=nrm((e, e)), b=nrm((1, e)), wr=nrm((1, e)), br=nrm((1, 1)))
                      for e in self.util_e]
        self.pair = {}
        for (i1, e1), (i2, e2) in combinations_with_replacement(enumerate(self.util_e), 2):
            es = e1
            self.pair[(i1, i2)] = dict(Wx=nrm((es, e1)), bx=nrm((1, es)),
                                       Wy=nrm((es, e1)), by=nrm((1, es)))
        self.num_pot = {i: 2 + (n - 1) for i in range(n)}
        self.reduce = [nrm((1, self.num_pot[i])) for i in range(n)]

        # ---- pack operands for the fused kernel (host side, once) ----
        # One wide lane-dense weight slab per utility: every matrix whose LHS is x_i,
        # pre-transposed so the kernel computes x @ W.  Matching biases concatenated.
        layout = dict(col_off={}, width={}, o_u={}, o_sx={}, o_sy={},
                      o_cx={}, o_cy={}, s_br={}, s_r={})
        w_blocks, b_blocks = [], []
        col = 0
        for i in range(n):
            layout["col_off"][i] = col
            off = 0
            layout["o_u"][i] = off
            w_blocks.append(jnp.asarray(self.unary[i]["W"], jnp.float32).T)
            b_blocks.append(jnp.asarray(self.unary[i]["b"], jnp.float32).reshape(-1))
            off += E
            q = self.pair[(i, i)]
            layout["o_sx"][i] = off
            w_blocks.append(jnp.asarray(q["Wx"], jnp.float32).T)
            b_blocks.append(jnp.asarray(q["bx"], jnp.float32).reshape(-1))
            off += E
            layout["o_sy"][i] = off
            w_blocks.append(jnp.asarray(q["Wy"], jnp.float32).T)
            b_blocks.append(jnp.asarray(q["by"], jnp.float32).reshape(-1))
            off += E
            for j in range(i + 1, n):          # utility i is the X operand of pair (i, j)
                q = self.pair[(i, j)]
                layout["o_cx"][(i, j)] = off
                w_blocks.append(jnp.asarray(q["Wx"], jnp.float32).T)
                b_blocks.append(jnp.asarray(q["bx"], jnp.float32).reshape(-1))
                off += E
            for j in range(i):                 # utility i is the Y operand of pair (j, i)
                q = self.pair[(j, i)]
                layout["o_cy"][(j, i)] = off
                w_blocks.append(jnp.asarray(q["Wy"], jnp.float32).T)
                b_blocks.append(jnp.asarray(q["by"], jnp.float32).reshape(-1))
                off += E
            layout["width"][i] = off
            col += off
        self.total_cols = col
        self.Wcat = jnp.concatenate(w_blocks, axis=1)                  # (E, total_cols)
        self.Bcat = jnp.concatenate(b_blocks).reshape(1, -1)           # (1, total_cols)
        self.WRcat = jnp.concatenate(
            [jnp.asarray(self.unary[i]["wr"], jnp.float32).reshape(-1)
             for i in range(n)]).reshape(1, -1)                        # (1, n*E)

        s_list = []
        for i in range(n):
            layout["s_br"][i] = len(s_list)
            s_list.append(float(self.unary[i]["br"][0, 0]))
        for i in range(n):
            layout["s_r"][i] = len(s_list)
            s_list.extend(float(v) for v in self.reduce[i][0])
        self.scal = jnp.asarray(s_list, jnp.float32)                   # SMEM scalars

        self.layout = layout
        self.kernel = make_fused_kernel(n, E, layout)

    def __call__(self, utils):
        assert len(utils) == self.n_utils
        n, E = self.n_utils, self.E
        B = utils[0].shape[0]
        spatial = [u.shape[1] for u in utils]

        # Batch-blocked grid: 2 steps (one per v7x TensorCore) when B is even,
        # otherwise a single step; amortizes per-step overhead on single-TC v5e/v6e.
        if B >= 2 and B % 2 == 0:
            num_blocks, Bb = 2, B // 2
        else:
            num_blocks, Bb = 1, B

        in_specs = [pl.BlockSpec(memory_space=pltpu.MemorySpace.SMEM)]
        in_specs += [pl.BlockSpec((Bb, spatial[i], E), lambda b: (b, 0, 0))
                     for i in range(n)]
        in_specs += [pl.BlockSpec((E, self.total_cols), lambda b: (0, 0)),
                     pl.BlockSpec((1, self.total_cols), lambda b: (0, 0)),
                     pl.BlockSpec((1, n * E), lambda b: (0, 0))]
        out_specs = pl.BlockSpec((1, Bb, n * E), lambda b: (b, 0, 0))
        out_shape = jax.ShapeDtypeStruct((num_blocks, Bb, n * E), jnp.float32)

        out = pl.pallas_call(
            self.kernel,
            out_shape=out_shape,
            grid=(num_blocks,),
            in_specs=in_specs,
            out_specs=out_specs,
            compiler_params=pltpu.CompilerParams(dimension_semantics=("parallel",)),
        )(self.scal, *utils, self.Wcat, self.Bcat, self.WRcat)

        out = out.reshape(B, n * E)
        return [out[:, i * E:(i + 1) * E] for i in range(n)]          # list of (B, E)


# --------------------------------------------------------------------------
# Pure-JAX reference for validation
# --------------------------------------------------------------------------
def reference_forward(model, utils):
    hp = jax.lax.Precision.HIGHEST

    def conv1x1(x, W, b):
        return jnp.einsum("bne,oe->bno", x, W, precision=hp) + b

    def unary_ref(x, p):
        xr = jnp.maximum(conv1x1(x, p["W"], p["b"]), 0.0)
        return jnp.einsum("bne,oe->bno", xr, p["wr"], precision=hp)[..., 0] + p["br"][0, 0]

    def pairwise_ref(x, y, q):
        xe = conv1x1(x, q["Wx"], q["bx"])
        ye = conv1x1(y, q["Wy"], q["by"])
        xn = xe / jnp.maximum(jnp.linalg.norm(xe, axis=-1, keepdims=True), 1e-12)
        yn = ye / jnp.maximum(jnp.linalg.norm(ye, axis=-1, keepdims=True), 1e-12)
        s = jnp.einsum("bne,bme->bnm", xn, yn, precision=hp)
        return s.mean(axis=2), s.mean(axis=1)

    factors = {i: [] for i in range(model.n_utils)}
    for i in range(model.n_utils):
        factors[i].append(unary_ref(utils[i], model.unary[i]))
        xp, _ = pairwise_ref(utils[i], utils[i], model.pair[(i, i)])
        factors[i].append(xp)
    for i, j in combinations_with_replacement(range(model.n_utils), 2):
        if i == j:
            continue
        fij, fji = pairwise_ref(utils[i], utils[j], model.pair[(i, j)])
        factors[i].append(fij)
        factors[j].append(fji)
    att = []
    for i in range(model.n_utils):
        F = jnp.stack(factors[i], axis=1)
        scores = jnp.einsum("op,bpn->bn", model.reduce[i], F, precision=hp)
        p = jax.nn.softmax(scores, axis=1)
        att.append(jnp.einsum("bn,bne->be", p, utils[i], precision=hp))
    return att


# --------------------------------------------------------------------------
if __name__ == "__main__":
    key = jax.random.PRNGKey(0)
    kp, k0, k1 = jax.random.split(key, 3)

    util_e = [32, 32]          # embedding dims (equal, as required by the reference cross-pair path)
    spatial = [8, 16]          # spatial sizes per utility
    B = 2

    utils = [
        jax.random.normal(k0, (B, spatial[0], util_e[0]), dtype=jnp.float32),
        jax.random.normal(k1, (B, spatial[1], util_e[1]), dtype=jnp.float32),
    ]

    model = AttenPallas(util_e, kp)
    out = model(utils)
    out = jax.block_until_ready(out)

    ref = reference_forward(model, utils)
    for a, r in zip(out, ref):
        assert a.shape == r.shape
        assert jnp.allclose(a, r, rtol=2e-3, atol=2e-3), (a, r)

    print("KERNEL_OK")
</pallas_src>

<mosaic_0001>
module attributes {stable_mosaic.version = 11 : i64} {
  func.func @kernel(%arg0: i32, %arg1: memref<8xf32, #tpu.memory_space<smem>>, %arg2: memref<1x8x32xf32, #tpu.memory_space<vmem>>, %arg3: memref<1x16x32xf32, #tpu.memory_space<vmem>>, %arg4: memref<32x256xf32, #tpu.memory_space<vmem>>, %arg5: memref<1x256xf32, #tpu.memory_space<vmem>>, %arg6: memref<1x64xf32, #tpu.memory_space<vmem>>, %arg7: memref<1x1x64xf32, #tpu.memory_space<vmem>>) attributes {dimension_semantics = [#tpu.dimension_semantics<parallel>], iteration_bounds = array<i64: 2>, scalar_prefetch = 0 : i64, scratch_operands = 0 : i64, tpu.core_type = #tpu.core_type<tc>, window_params = [{transform_indices = @transform_0, window_bounds = array<i64: 8>}, {transform_indices = @transform_1, window_bounds = array<i64: 1, 8, 32>}, {transform_indices = @transform_2, window_bounds = array<i64: 1, 16, 32>}, {pipeline_mode = #tpu.pipeline_mode<synchronous>, transform_indices = @transform_3, window_bounds = array<i64: 32, 256>}, {pipeline_mode = #tpu.pipeline_mode<synchronous>, transform_indices = @transform_4, window_bounds = array<i64: 1, 256>}, {pipeline_mode = #tpu.pipeline_mode<synchronous>, transform_indices = @transform_5, window_bounds = array<i64: 1, 64>}, {transform_indices = @transform_6, window_bounds = array<i64: 1, 1, 64>}]} {
    %c0 = arith.constant 0 : index
    %c0_0 = arith.constant 0 : index
    %c0_1 = arith.constant 0 : index
    %0 = vector.load %arg2[%c0, %c0_0, %c0_1] : memref<1x8x32xf32, #tpu.memory_space<vmem>>, vector<1x8x32xf32>
    %1 = vector.shape_cast %0 : vector<1x8x32xf32> to vector<8x32xf32>
    %c0_2 = arith.constant 0 : index
    %c0_3 = arith.constant 0 : index
    %2 = vector.load %arg4[%c0_2, %c0_3] : memref<32x256xf32, #tpu.memory_space<vmem>>, vector<32x128xf32>
    %cst = arith.constant dense<0.000000e+00> : vector<8x128xf32>
    %3 = tpu.matmul %1, %2, %cst {dimension_numbers = #tpu.dot_dimension_numbers<[1], [0], [0], [1], [0, 0, 1, 1], [], []>} : vector<8x32xf32>, vector<32x128xf32>, vector<8x128xf32> -> vector<8x128xf32>
    %c0_4 = arith.constant 0 : index
    %c0_5 = arith.constant 0 : index
    %4 = vector.load %arg5[%c0_4, %c0_5] : memref<1x256xf32, #tpu.memory_space<vmem>>, vector<1x128xf32>
    %5 = vector.broadcast %4 : vector<1x128xf32> to vector<8x128xf32>
    %6 = arith.addf %3, %5 : vector<8x128xf32>
    %7 = vector.shape_cast %6 : vector<8x128xf32> to vector<1x8x128xf32>
    %c0_6 = arith.constant 0 : index
    %c0_7 = arith.constant 0 : index
    %c0_8 = arith.constant 0 : index
    %8 = vector.load %arg3[%c0_6, %c0_7, %c0_8] : memref<1x16x32xf32, #tpu.memory_space<vmem>>, vector<1x16x32xf32>
    %9 = vector.shape_cast %8 : vector<1x16x32xf32> to vector<16x32xf32>
    %c0_9 = arith.constant 0 : index
    %c128 = arith.constant 128 : index
    %10 = vector.load %arg4[%c0_9, %c128] : memref<32x256xf32, #tpu.memory_space<vmem>>, vector<32x128xf32>
    %cst_10 = arith.constant dense<0.000000e+00> : vector<16x128xf32>
    %11 = tpu.matmul %9, %10, %cst_10 {dimension_numbers = #tpu.dot_dimension_numbers<[1], [0], [0], [1], [0, 0, 1, 1], [], []>} : vector<16x32xf32>, vector<32x128xf32>, vector<16x128xf32> -> vector<16x128xf32>
    %c0_11 = arith.constant 0 : index
    %c128_12 = arith.constant 128 : index
    %12 = vector.load %arg5[%c0_11, %c128_12] : memref<1x256xf32, #tpu.memory_space<vmem>>, vector<1x128xf32>
    %13 = vector.broadcast %12 : vector<1x128xf32> to vector<16x128xf32>
    %14 = arith.addf %11, %13 : vector<16x128xf32>
    %15 = vector.shape_cast %14 : vector<16x128xf32> to vector<1x16x128xf32>
    %16 = vector.extract_strided_slice %7 {offsets = [0, 0, 0], sizes = [1, 8, 32], strides = [1, 1, 1]} : vector<1x8x128xf32> to vector<1x8x32xf32>
    %cst_13 = arith.constant 0.000000e+00 : f32
    %17 = vector.broadcast %cst_13 : f32 to vector<1x8x32xf32>
    %18 = arith.maximumf %16, %17 : vector<1x8x32xf32>
    %c0_14 = arith.constant 0 : index
    %c0_15 = arith.constant 0 : index
    %19 = vector.load %arg6[%c0_14, %c0_15] : memref<1x64xf32, #tpu.memory_space<vmem>>, vector<1x32xf32>
    %20 = vector.shape_cast %19 : vector<1x32xf32> to vector<1x1x32xf32>
    %21 = vector.broadcast %20 : vector<1x1x32xf32> to vector<1x8x32xf32>
    %22 = arith.mulf %18, %21 : vector<1x8x32xf32>
    %cst_16 = arith.constant dense<0.000000e+00> : vector<1x8xf32>
    %23 = vector.multi_reduction <add>, %22, %cst_16 [2] : vector<1x8x32xf32> to vector<1x8xf32>
    %24 = vector.shape_cast %23 : vector<1x8xf32> to vector<1x8x1xf32>
    %c0_17 = arith.constant 0 : index
    %25 = memref.load %arg1[%c0_17] : memref<8xf32, #tpu.memory_space<smem>>
    %26 = vector.broadcast %25 : f32 to vector<1x8x1xf32>
    %27 = arith.addf %24, %26 : vector<1x8x1xf32>
    %28 = vector.extract_strided_slice %7 {offsets = [0, 0, 32], sizes = [1, 8, 32], strides = [1, 1, 1]} : vector<1x8x128xf32> to vector<1x8x32xf32>
    %29 = arith.mulf %28, %28 : vector<1x8x32xf32>
    %cst_18 = arith.constant dense<0.000000e+00> : vector<1x8xf32>
    %30 = vector.multi_reduction <add>, %29, %cst_18 [2] : vector<1x8x32xf32> to vector<1x8xf32>
    %31 = vector.shape_cast %30 : vector<1x8xf32> to vector<1x8x1xf32>
    %cst_19 = arith.constant 1.000000e-24 : f32
    %32 = vector.broadcast %cst_19 : f32 to vector<1x8x1xf32>
    %33 = arith.maximumf %31, %32 : vector<1x8x1xf32>
    %34 = math.rsqrt %33 : vector<1x8x1xf32>
    %35 = vector.broadcast %34 : vector<1x8x1xf32> to vector<1x8x32xf32>
    %36 = arith.mulf %28, %35 : vector<1x8x32xf32>
    %37 = vector.extract_strided_slice %7 {offsets = [0, 0, 64], sizes = [1, 8, 32], strides = [1, 1, 1]} : vector<1x8x128xf32> to vector<1x8x32xf32>
    %38 = arith.mulf %37, %37 : vector<1x8x32xf32>
    %cst_20 = arith.constant dense<0.000000e+00> : vector<1x8xf32>
    %39 = vector.multi_reduction <add>, %38, %cst_20 [2] : vector<1x8x32xf32> to vector<1x8xf32>
    %40 = vector.shape_cast %39 : vector<1x8xf32> to vector<1x8x1xf32>
    %cst_21 = arith.constant 1.000000e-24 : f32
    %41 = vector.broadcast %cst_21 : f32 to vector<1x8x1xf32>
    %42 = arith.maximumf %40, %41 : vector<1x8x1xf32>
    %43 = math.rsqrt %42 : vector<1x8x1xf32>
    %44 = vector.broadcast %43 : vector<1x8x1xf32> to vector<1x8x32xf32>
    %45 = arith.mulf %37, %44 : vector<1x8x32xf32>
    %cst_22 = arith.constant dense<0.000000e+00> : vector<1x32xf32>
    %46 = vector.multi_reduction <add>, %45, %cst_22 [1] : vector<1x8x32xf32> to vector<1x32xf32>
    %47 = vector.shape_cast %46 : vector<1x32xf32> to vector<1x1x32xf32>
    %cst_23 = arith.constant 8.000000e+00 : f32
    %48 = vector.broadcast %cst_23 : f32 to vector<1x1x32xf32>
    %49 = arith.divf %47, %48 : vector<1x1x32xf32>
    %50 = vector.broadcast %49 : vector<1x1x32xf32> to vector<1x8x32xf32>
    %51 = arith.mulf %36, %50 : vector<1x8x32xf32>
    %cst_24 = arith.constant dense<0.000000e+00> : vector<1x8xf32>
    %52 = vector.multi_reduction <add>, %51, %cst_24 [2] : vector<1x8x32xf32> to vector<1x8xf32>
    %53 = vector.shape_cast %52 : vector<1x8xf32> to vector<1x8x1xf32>
    %54 = vector.extract_strided_slice %15 {offsets = [0, 0, 0], sizes = [1, 16, 32], strides = [1, 1, 1]} : vector<1x16x128xf32> to vector<1x16x32xf32>
    %cst_25 = arith.constant 0.000000e+00 : f32
    %55 = vector.broadcast %cst_25 : f32 to vector<1x16x32xf32>
    %56 = arith.maximumf %54, %55 : vector<1x16x32xf32>
    %c0_26 = arith.constant 0 : index
    %c32 = arith.constant 32 : index
    %57 = vector.load %arg6[%c0_26, %c32] : memref<1x64xf32, #tpu.memory_space<vmem>>, vector<1x32xf32>
    %58 = vector.shape_cast %57 : vector<1x32xf32> to vector<1x1x32xf32>
    %59 = vector.broadcast %58 : vector<1x1x32xf32> to vector<1x16x32xf32>
    %60 = arith.mulf %56, %59 : vector<1x16x32xf32>
    %cst_27 = arith.constant dense<0.000000e+00> : vector<1x16xf32>
    %61 = vector.multi_reduction <add>, %60, %cst_27 [2] : vector<1x16x32xf32> to vector<1x16xf32>
    %62 = vector.shape_cast %61 : vector<1x16xf32> to vector<1x16x1xf32>
    %c1 = arith.constant 1 : index
    %63 = memref.load %arg1[%c1] : memref<8xf32, #tpu.memory_space<smem>>
    %64 = vector.broadcast %63 : f32 to vector<1x16x1xf32>
    %65 = arith.addf %62, %64 : vector<1x16x1xf32>
    %66 = vector.extract_strided_slice %15 {offsets = [0, 0, 32], sizes = [1, 16, 32], strides = [1, 1, 1]} : vector<1x16x128xf32> to vector<1x16x32xf32>
    %67 = arith.mulf %66, %66 : vector<1x16x32xf32>
    %cst_28 = arith.constant dense<0.000000e+00> : vector<1x16xf32>
    %68 = vector.multi_reduction <add>, %67, %cst_28 [2] : vector<1x16x32xf32> to vector<1x16xf32>
    %69 = vector.shape_cast %68 : vector<1x16xf32> to vector<1x16x1xf32>
    %cst_29 = arith.constant 1.000000e-24 : f32
    %70 = vector.broadcast %cst_29 : f32 to vector<1x16x1xf32>
    %71 = arith.maximumf %69, %70 : vector<1x16x1xf32>
    %72 = math.rsqrt %71 : vector<1x16x1xf32>
    %73 = vector.broadcast %72 : vector<1x16x1xf32> to vector<1x16x32xf32>
    %74 = arith.mulf %66, %73 : vector<1x16x32xf32>
    %75 = vector.extract_strided_slice %15 {offsets = [0, 0, 64], sizes = [1, 16, 32], strides = [1, 1, 1]} : vector<1x16x128xf32> to vector<1x16x32xf32>
    %76 = arith.mulf %75, %75 : vector<1x16x32xf32>
    %cst_30 = arith.constant dense<0.000000e+00> : vector<1x16xf32>
    %77 = vector.multi_reduction <add>, %76, %cst_30 [2] : vector<1x16x32xf32> to vector<1x16xf32>
    %78 = vector.shape_cast %77 : vector<1x16xf32> to vector<1x16x1xf32>
    %cst_31 = arith.constant 1.000000e-24 : f32
    %79 = vector.broadcast %cst_31 : f32 to vector<1x16x1xf32>
    %80 = arith.maximumf %78, %79 : vector<1x16x1xf32>
    %81 = math.rsqrt %80 : vector<1x16x1xf32>
    %82 = vector.broadcast %81 : vector<1x16x1xf32> to vector<1x16x32xf32>
    %83 = arith.mulf %75, %82 : vector<1x16x32xf32>
    %cst_32 = arith.constant dense<0.000000e+00> : vector<1x32xf32>
    %84 = vector.multi_reduction <add>, %83, %cst_32 [1] : vector<1x16x32xf32> to vector<1x32xf32>
    %85 = vector.shape_cast %84 : vector<1x32xf32> to vector<1x1x32xf32>
    %cst_33 = arith.constant 1.600000e+01 : f32
    %86 = vector.broadcast %cst_33 : f32 to vector<1x1x32xf32>
    %87 = arith.divf %85, %86 : vector<1x1x32xf32>
    %88 = vector.broadcast %87 : vector<1x1x32xf32> to vector<1x16x32xf32>
    %89 = arith.mulf %74, %88 : vector<1x16x32xf32>
    %cst_34 = arith.constant dense<0.000000e+00> : vector<1x16xf32>
    %90 = vector.multi_reduction <add>, %89, %cst_34 [2] : vector<1x16x32xf32> to vector<1x16xf32>
    %91 = vector.shape_cast %90 : vector<1x16xf32> to vector<1x16x1xf32>
    %92 = vector.extract_strided_slice %7 {offsets = [0, 0, 96], sizes = [1, 8, 32], strides = [1, 1, 1]} : vector<1x8x128xf32> to vector<1x8x32xf32>
    %93 = arith.mulf %92, %92 : vector<1x8x32xf32>
    %cst_35 = arith.constant dense<0.000000e+00> : vector<1x8xf32>
    %94 = vector.multi_reduction <add>, %93, %cst_35 [2] : vector<1x8x32xf32> to vector<1x8xf32>
    %95 = vector.shape_cast %94 : vector<1x8xf32> to vector<1x8x1xf32>
    %cst_36 = arith.constant 1.000000e-24 : f32
    %96 = vector.broadcast %cst_36 : f32 to vector<1x8x1xf32>
    %97 = arith.maximumf %95, %96 : vector<1x8x1xf32>
    %98 = math.rsqrt %97 : vector<1x8x1xf32>
    %99 = vector.broadcast %98 : vector<1x8x1xf32> to vector<1x8x32xf32>
    %100 = arith.mulf %92, %99 : vector<1x8x32xf32>
    %101 = vector.extract_strided_slice %15 {offsets = [0, 0, 96], sizes = [1, 16, 32], strides = [1, 1, 1]} : vector<1x16x128xf32> to vector<1x16x32xf32>
    %102 = arith.mulf %101, %101 : vector<1x16x32xf32>
    %cst_37 = arith.constant dense<0.000000e+00> : vector<1x16xf32>
    %103 = vector.multi_reduction <add>, %102, %cst_37 [2] : vector<1x16x32xf32> to vector<1x16xf32>
    %104 = vector.shape_cast %103 : vector<1x16xf32> to vector<1x16x1xf32>
    %cst_38 = arith.constant 1.000000e-24 : f32
    %105 = vector.broadcast %cst_38 : f32 to vector<1x16x1xf32>
    %106 = arith.maximumf %104, %105 : vector<1x16x1xf32>
    %107 = math.rsqrt %106 : vector<1x16x1xf32>
    %108 = vector.broadcast %107 : vector<1x16x1xf32> to vector<1x16x32xf32>
    %109 = arith.mulf %101, %108 : vector<1x16x32xf32>
    %cst_39 = arith.constant dense<0.000000e+00> : vector<1x32xf32>
    %110 = vector.multi_reduction <add>, %109, %cst_39 [1] : vector<1x16x32xf32> to vector<1x32xf32>
    %111 = vector.shape_cast %110 : vector<1x32xf32> to vector<1x1x32xf32>
    %cst_40 = arith.constant 1.600000e+01 : f32
    %112 = vector.broadcast %cst_40 : f32 to vector<1x1x32xf32>
    %113 = arith.divf %111, %112 : vector<1x1x32xf32>
    %cst_41 = arith.constant dense<0.000000e+00> : vector<1x32xf32>
    %114 = vector.multi_reduction <add>, %100, %cst_41 [1] : vector<1x8x32xf32> to vector<1x32xf32>
    %115 = vector.shape_cast %114 : vector<1x32xf32> to vector<1x1x32xf32>
    %cst_42 = arith.constant 8.000000e+00 : f32
    %116 = vector.broadcast %cst_42 : f32 to vector<1x1x32xf32>
    %117 = arith.divf %115, %116 : vector<1x1x32xf32>
    %118 = vector.broadcast %113 : vector<1x1x32xf32> to vector<1x8x32xf32>
    %119 = arith.mulf %100, %118 : vector<1x8x32xf32>
    %cst_43 = arith.constant dense<0.000000e+00> : vector<1x8xf32>
    %120 = vector.multi_reduction <add>, %119, %cst_43 [2] : vector<1x8x32xf32> to vector<1x8xf32>
    %121 = vector.shape_cast %120 : vector<1x8xf32> to vector<1x8x1xf32>
    %122 = vector.broadcast %117 : vector<1x1x32xf32> to vector<1x16x32xf32>
    %123 = arith.mulf %109, %122 : vector<1x16x32xf32>
    %cst_44 = arith.constant dense<0.000000e+00> : vector<1x16xf32>
    %124 = vector.multi_reduction <add>, %123, %cst_44 [2] : vector<1x16x32xf32> to vector<1x16xf32>
    %125 = vector.shape_cast %124 : vector<1x16xf32> to vector<1x16x1xf32>
    %c2 = arith.constant 2 : index
    %126 = memref.load %arg1[%c2] : memref<8xf32, #tpu.memory_space<smem>>
    %127 = vector.broadcast %126 : f32 to vector<1x8x1xf32>
    %128 = arith.mulf %27, %127 : vector<1x8x1xf32>
    %c3 = arith.constant 3 : index
    %129 = memref.load %arg1[%c3] : memref<8xf32, #tpu.memory_space<smem>>
    %130 = vector.broadcast %129 : f32 to vector<1x8x1xf32>
    %131 = arith.mulf %53, %130 : vector<1x8x1xf32>
    %132 = arith.addf %128, %131 : vector<1x8x1xf32>
    %c4 = arith.constant 4 : index
    %133 = memref.load %arg1[%c4] : memref<8xf32, #tpu.memory_space<smem>>
    %134 = vector.broadcast %133 : f32 to vector<1x8x1xf32>
    %135 = arith.mulf %121, %134 : vector<1x8x1xf32>
    %136 = arith.addf %132, %135 : vector<1x8x1xf32>
    %cst_45 = arith.constant dense<0xFF800000> : vector<1x1xf32>
    %137 = vector.multi_reduction <maximumf>, %136, %cst_45 [1] : vector<1x8x1xf32> to vector<1x1xf32>
    %138 = vector.shape_cast %137 : vector<1x1xf32> to vector<1x1x1xf32>
    %139 = vector.broadcast %138 : vector<1x1x1xf32> to vector<1x8x1xf32>
    %140 = arith.subf %136, %139 : vector<1x8x1xf32>
    %141 = math.exp %140 : vector<1x8x1xf32>
    %cst_46 = arith.constant dense<0.000000e+00> : vector<1x1xf32>
    %142 = vector.multi_reduction <add>, %141, %cst_46 [1] : vector<1x8x1xf32> to vector<1x1xf32>
    %143 = vector.shape_cast %142 : vector<1x1xf32> to vector<1x1x1xf32>
    %144 = tpu.reciprocal %143 {approx = true} : vector<1x1x1xf32> -> vector<1x1x1xf32>
    %145 = vector.broadcast %144 : vector<1x1x1xf32> to vector<1x8x1xf32>
    %146 = arith.mulf %141, %145 : vector<1x8x1xf32>
    %147 = vector.broadcast %146 : vector<1x8x1xf32> to vector<1x8x32xf32>
    %148 = arith.mulf %147, %0 : vector<1x8x32xf32>
    %cst_47 = arith.constant dense<0.000000e+00> : vector<1x32xf32>
    %149 = vector.multi_reduction <add>, %148, %cst_47 [1] : vector<1x8x32xf32> to vector<1x32xf32>
    %c5 = arith.constant 5 : index
    %150 = memref.load %arg1[%c5] : memref<8xf32, #tpu.memory_space<smem>>
    %151 = vector.broadcast %150 : f32 to vector<1x16x1xf32>
    %152 = arith.mulf %65, %151 : vector<1x16x1xf32>
    %c6 = arith.constant 6 : index
    %153 = memref.load %arg1[%c6] : memref<8xf32, #tpu.memory_space<smem>>
    %154 = vector.broadcast %153 : f32 to vector<1x16x1xf32>
    %155 = arith.mulf %91, %154 : vector<1x16x1xf32>
    %156 = arith.addf %152, %155 : vector<1x16x1xf32>
    %c7 = arith.constant 7 : index
    %157 = memref.load %arg1[%c7] : memref<8xf32, #tpu.memory_space<smem>>
    %158 = vector.broadcast %157 : f32 to vector<1x16x1xf32>
    %159 = arith.mulf %125, %158 : vector<1x16x1xf32>
    %160 = arith.addf %156, %159 : vector<1x16x1xf32>
    %cst_48 = arith.constant dense<0xFF800000> : vector<1x1xf32>
    %161 = vector.multi_reduction <maximumf>, %160, %cst_48 [1] : vector<1x16x1xf32> to vector<1x1xf32>
    %162 = vector.shape_cast %161 : vector<1x1xf32> to vector<1x1x1xf32>
    %163 = vector.broadcast %162 : vector<1x1x1xf32> to vector<1x16x1xf32>
    %164 = arith.subf %160, %163 : vector<1x16x1xf32>
    %165 = math.exp %164 : vector<1x16x1xf32>
    %cst_49 = arith.constant dense<0.000000e+00> : vector<1x1xf32>
    %166 = vector.multi_reduction <add>, %165, %cst_49 [1] : vector<1x16x1xf32> to vector<1x1xf32>
    %167 = vector.shape_cast %166 : vector<1x1xf32> to vector<1x1x1xf32>
    %168 = tpu.reciprocal %167 {approx = true} : vector<1x1x1xf32> -> vector<1x1x1xf32>
    %169 = vector.broadcast %168 : vector<1x1x1xf32> to vector<1x16x1xf32>
    %170 = arith.mulf %165, %169 : vector<1x16x1xf32>
    %171 = vector.broadcast %170 : vector<1x16x1xf32> to vector<1x16x32xf32>
    %172 = arith.mulf %171, %8 : vector<1x16x32xf32>
    %cst_50 = arith.constant dense<0.000000e+00> : vector<1x32xf32>
    %173 = vector.multi_reduction <add>, %172, %cst_50 [1] : vector<1x16x32xf32> to vector<1x32xf32>
    %174 = tpu.concatenate %149, %173 in 1 : vector<1x32xf32>, vector<1x32xf32> -> vector<1x64xf32>
    %c0_51 = arith.constant 0 : index
    %c0_52 = arith.constant 0 : index
    %c0_53 = arith.constant 0 : index
    %175 = vector.load %arg7[%c0_51, %c0_52, %c0_53] : memref<1x1x64xf32, #tpu.memory_space<vmem>>, vector<1x1x64xf32>
    %176 = vector.shape_cast %175 : vector<1x1x64xf32> to vector<1x64xf32>
    %177 = vector.shape_cast %174 : vector<1x64xf32> to vector<1x1x64xf32>
    tpu.vector_store %arg7[%c0_51, %c0_52, %c0_53], %177 {strides = array<i32>} : memref<1x1x64xf32, #tpu.memory_space<vmem>>, vector<1x1x64xf32>,
    return
  }
  func.func @transform_0(%arg0: i32) -> i32 {
    %c0_i32 = arith.constant 0 : i32
    %c0_i32_0 = arith.constant 0 : i32
    return %c0_i32 : i32
  }
  func.func @transform_1(%arg0: i32) -> (i32, i32, i32) {
    %c0_i32 = arith.constant 0 : i32
    %c0_i32_0 = arith.constant 0 : i32
    %c0_i32_1 = arith.constant 0 : i32
    return %arg0, %c0_i32, %c0_i32_0 : i32, i32, i32
  }
  func.func @transform_2(%arg0: i32) -> (i32, i32, i32) {
    %c0_i32 = arith.constant 0 : i32
    %c0_i32_0 = arith.constant 0 : i32
    %c0_i32_1 = arith.constant 0 : i32
    return %arg0, %c0_i32, %c0_i32_0 : i32, i32, i32
  }
  func.func @transform_3(%arg0: i32) -> (i32, i32) {
    %c0_i32 = arith.constant 0 : i32
    %c0_i32_0 = arith.constant 0 : i32
    %c0_i32_1 = arith.constant 0 : i32
    return %c0_i32, %c0_i32_0 : i32, i32
  }
  func.func @transform_4(%arg0: i32) -> (i32, i32) {
    %c0_i32 = arith.constant 0 : i32
    %c0_i32_0 = arith.constant 0 : i32
    %c0_i32_1 = arith.constant 0 : i32
    return %c0_i32, %c0_i32_0 : i32, i32
  }
  func.func @transform_5(%arg0: i32) -> (i32, i32) {
    %c0_i32 = arith.constant 0 : i32
    %c0_i32_0 = arith.constant 0 : i32
    %c0_i32_1 = arith.constant 0 : i32
    return %c0_i32, %c0_i32_0 : i32, i32
  }
  func.func @transform_6(%arg0: i32) -> (i32, i32, i32) {
    %c0_i32 = arith.constant 0 : i32
    %c0_i32_0 = arith.constant 0 : i32
    %c0_i32_1 = arith.constant 0 : i32
    return %arg0, %c0_i32, %c0_i32_0 : i32, i32, i32
  }
}

</mosaic_0001>

<bundles_post_ra>
// kernel: tpu_custom_call.1
= control target key start
LH: loop header
LB: loop body
LE: loop exit
PB: predicated region body
PF: predicated region fallthrough
CT: control target
= control target key end

     0   :  { %s1743_s0 = inlined_call_operand.hbm [shape: f32[8], index: 0, kind: input, shape index: {}]   ;;  %s1744_s1 = inlined_call_operand.hbm [shape: f32[2,8,32], index: 1, kind: input, shape index: {}]   ;;  %s1745_s2 = inlined_call_operand.hbm [shape: f32[2,16,32], index: 2, kind: input, shape index: {}]   ;;  %s1746_s3 = inlined_call_operand.hbm [shape: f32[32,256], index: 3, kind: input, shape index: {}]   ;;  %s1747_s4 = inlined_call_operand.vmem [shape: f32[1,256], index: 4, kind: input, shape index: {}]   ;;  %s1748_s5 = inlined_call_operand.vmem [shape: f32[1,64], index: 5, kind: input, shape index: {}]   ;;  %s1749_s6 = inlined_call_operand.hbm [shape: f32[2,1,64], index: 6, kind: output, shape index: {}]  }
   0x1   :  { %1753 = sst [smem:[#allocation16_spill]] %s1743_s0 }
   0x2   :  { %1754 = sst [smem:[#allocation17_spill]] %s1744_s1 }
   0x3   :  { %11 = vsyncpa [#allocation5], 0 }
   0x4   :  { %12 = vsyncpa [#allocation3], 0 }
   0x5   :  { %14 = vsyncpa [#allocation3 + $0x1], 0 }
   0x6   :  { %15 = vsyncpa [#allocation8], 0 }
   0x7   :  { %17 = vsyncpa [#allocation8 + $0x1], 0 }
   0x8   :  { %18 = vsyncpa [#allocation4], 0 }
   0x9   :  { %20 = vsyncpa [#allocation4 + $0x1], 0  ;;  %s1363_s21 = smov 0   ;;  %s1365_s22 = smov 0  }
   0xa   :  { %s1367_s23 = smov 0   ;;  %s1369_s24 = smov 0  }
   0xb LB: > { %s1384_s25 = sadd.s32 4294967295, %s1311_s24   ;;  %s943_s26 = sadd.s32 4294967294, %s1311_s24   ;;  %s1311_s24 = sphi %s1369_s24, %s1776_s24   ;;  %s1307_s23 = sphi %s1367_s23, %s1775_s23   ;;  %s1303_s22 = sphi %s1365_s22, %s1774_s22   ;;  %s1299_s21 = sphi %s1363_s21, %s1773_s21  }
   0xc   : > { %p67_p0 = scmp.ne.s32.totalorder %s1303_s22, %s1299_s21  ;;  %p1750_p1 = scmp.eq.s32.totalorder %s1384_s25, 0 }
   0xd   : > { %p186_p3 = scmp.eq.s32.totalorder %s943_s26, 1  ;;  %p944_p5 = scmp.ge.s32.totalorder %s1311_s24, 1 }
   0xe   : > { %p1393_p4 = por %p1750_p1, %p67_p0  ;;  %p193_p7 = scmp.lt.s32.totalorder %s1311_s24, 3 }
   0xf   : > { %p1398_p6 = por %p186_p3, %p67_p0  ;;  %s1313_s30 = smov [#allocation9]  }
  0x10   : > { %s1755_s27 = scalar_select %p1393_p4, 1, 0 }
  0x11   : > { %s1756_s28 = scalar_select %p1398_p6, 1, 0 }
  0x12   : > { %p1403_p8 = pnand %p944_p5, %p193_p7  ;;  %s214_s7 = sshll.u32 %s1313_s30, 4  ;;  %s215_s7 = int_to_ptr.vmem [resolvable:$true] %s214_s7 }
  0x13   : > { %s1417_s9 = sadd.s32 1, %s1311_s24   ;;  %s1132_s13 = scalar_lea.hbm %s1746_s3, 1024 }
  0x14   : > { %s1757_s29 = scalar_select %p1403_p8, 1, 0 }
  0x15   : > { %p1036_p9 = pneg %p1403_p8  ;;  %s51_s10 = ssub.s32 %s1311_s24, %s1417_s9 }
  0x16   : > { %p1133_p12 = scmp.ne.s32.totalorder %s1746_s3, %s1132_s13  ;;  %p1139_p5 = scmp.lt.u32.totalorder %s1132_s13, %s1746_s3 }
  0x17   : > { %p1412_p11 = pnand %p1036_p9, %p1750_p1 }
  0x19   : > { %p1134_p13 = pneg %p1412_p11 }
  0x1b   : > { %p1135_p0 = pnand %p1134_p13, %p1133_p12 }
  0x1d   : > { %p1136_p3 = pneg %p1135_p0 }
  0x1f   : > { %p1141_p7 = pnand %p1139_p5, %p1136_p3 }
  0x21   : > { %1144 = shalt.err (!%p1141_p7)
}
  0x22   : > { %s1145_s18 = scalar_lea.vmem %s215_s7, 1024  ;;  %p1153_p2 = scmp.lt.s32.totalorder %s215_s7, %s215_s7 }
  0x23   : > { %p1146_p9 = scmp.ne.s32.totalorder %s215_s7, %s1145_s18  ;;  %p1154_p6 = scmp.lt.s32.totalorder %s1145_s18, %s1145_s18 }
  0x25   : > { %p1148_p10 = pnand %p1146_p9, %p1134_p13  ;;  %p1155_p4 = por %p1154_p6, %p1153_p2 }
  0x27   : > { %p1149_p1 = pneg %p1148_p10 }
  0x29   : > { %p1156_p8 = pnand %p1155_p4, %p1149_p1 }
  0x2b   : > { %1159 = shalt.err (!%p1156_p8)
}
  0x2c   : > { %s1314_s19 = smov 256   ;;  %s1315_s20 = smov 16  }
  0x2d   : > { %1042 = dma.hbm_to_vmem [thread:$0]  (!%p1412_p11), %s1746_s3, 1024, %s215_s7, [#allocation8], %s1314_s19, %s1314_s19, %s1315_s20  }
  0x2e   : > { %s1759_s0 = sld [smem:[#allocation16_spill]] }
  0x34   : > { %s1160_s13 = scalar_lea.hbm %s1759_s0, 16 }
  0x35   : > { %p1161_p10 = scmp.ne.s32.totalorder %s1759_s0, %s1160_s13  ;;  %p1167_p4 = scmp.lt.u32.totalorder %s1160_s13, %s1759_s0 }
  0x37   : > { %p1163_p1 = pnand %p1161_p10, %p1134_p13 }
  0x39   : > { %p1164_p2 = pneg %p1163_p1 }
  0x3b   : > { %p1169_p6 = pnand %p1167_p4, %p1164_p2 }
  0x3d   : > { %1172 = shalt.err (!%p1169_p6)
}
  0x3e   : > { %s1316_s18 = smov [#allocation2]   ;;  %p52_p8 = scmp.eq.s32.totalorder %s51_s10, 0 }
  0x3f   : > { %1039 = dma.hbm_to_smem (!%p1412_p11), %s1759_s0, 16, %s1316_s18, [#allocation5]  }
  0x40   : > { %s54_s20 = sadd.s32 1, %s1307_s23  ;;  %p61_p12 = scmp.ne.s32.totalorder %s1307_s23, %s1303_s22 }
  0x41   : > { %p62_p13 = scmp.eq.s32.totalorder %s1311_s24, 0  ;;  %p1760_p3 = scmp.eq.s32.totalorder %s1384_s25, 1 }
  0x42   : > { %s1468_s8 = scalar_select %p52_p8, %s1307_s23, %s54_s20  }
  0x43   : > { %p63_p0 = por %p62_p13, %p61_p12  ;;  %p1472_p5 = por %p1760_p3, %p61_p12 }
  0x44   : > { %p1056_p7 = scmp.lt.s32.totalorder %s1311_s24, 2  ;;  %s1478_s30 = sand.u32 1, %s1307_s23  }
  0x45   : > { %s948_s11 = sshll.u32 %s1478_s30, 3  ;;  %s949_s10 = sshll.u32 %s1311_s24, 7 }
  0x46   : > { %s1762_s1 = sld [smem:[#allocation17_spill]]  ;;  %s238_s15 = scalar_lea.vmem [#allocation6], %s948_s11 }
  0x47   : > { %s245_s16 = sshll.u32 %s238_s15, 4  ;;  %p1489_p11 = pnand %p1056_p7, %p63_p0  ;;  %s1487_s16 = int_to_ptr.vmem [resolvable:$true] %s245_s16 }
  0x48   : > { %s950_s18 = sshll.u32 %s1478_s30, 4  ;;  %s235_s19 = scalar_lea.sflag [#allocation3], %s1478_s30 }
  0x49   : > { %p1175_p10 = pneg %p1489_p11 }
  0x4c   : > { %s1485_s14 = scalar_lea.hbm %s1762_s1, %s949_s10  ;;  %s1178_s12 = scalar_lea.hbm %s1762_s1, 256 }
  0x4d   : > { %s1173_s20 = scalar_lea.hbm %s1485_s14, 128  ;;  %p1179_p4 = scmp.lt.u32.totalorder %s1485_s14, %s1762_s1 }
  0x4e   : > { %p1174_p9 = scmp.ne.s32.totalorder %s1485_s14, %s1173_s20  ;;  %p1180_p6 = scmp.lt.u32.totalorder %s1178_s12, %s1173_s20 }
  0x4f   : > { %p1182_p12 = scmp.lt.u32.totalorder %s1173_s20, %s1485_s14 }
  0x50   : > { %p1176_p1 = pnand %p1175_p10, %p1174_p9  ;;  %p1181_p8 = por %p1180_p6, %p1179_p4 }
  0x52   : > { %p1177_p2 = pneg %p1176_p1  ;;  %p1183_p13 = por %p1182_p12, %p1181_p8 }
  0x54   : > { %p1184_p0 = pnand %p1183_p13, %p1177_p2 }
  0x56   : > { %1187 = shalt.err (!%p1184_p0)
}
  0x57   : > { %s1188_s7 = scalar_lea.vmem %s1487_s16, 128  ;;  %s1317_s11 = smov [#allocation6]  }
  0x58   : > { %p1189_p3 = scmp.ne.s32.totalorder %s1487_s16, %s1188_s7  ;;  %s1193_s10 = sshll.u32 %s1317_s11, 4  ;;  %s1194_s10 = int_to_ptr.vmem [resolvable:$false] %s1193_s10 }
  0x59   : > { %s1195_s13 = scalar_lea.vmem %s1194_s10, 256  ;;  %p1196_p1 = scmp.lt.s32.totalorder %s1487_s16, %s1194_s10 }
  0x5a   : > { %p1191_p7 = pnand %p1189_p3, %p1175_p10  ;;  %p1197_p4 = scmp.lt.s32.totalorder %s1195_s13, %s1188_s7 }
  0x5c   : > { %p1192_p9 = pneg %p1191_p7  ;;  %p1198_p6 = por %p1197_p4, %p1196_p1 }
  0x5e   : > { %p1199_p8 = pnand %p1198_p6, %p1192_p9 }
  0x60   : > { %1202 = shalt.err (!%p1199_p8)
}
  0x61   : > { %1046 = dma.hbm_to_vmem [thread:$0]  (!%p1489_p11), %s1485_s14, 128, %s1487_s16, %s235_s19  }
  0x62   : > { %s256_s20 = scalar_lea.vmem [#allocation7], %s950_s18  ;;  %s974_s15 = sshll.u32 %s1311_s24, 8 }
  0x63   : > { %s263_s12 = sshll.u32 %s256_s20, 4  ;;  %s1529_s10 = scalar_lea.hbm %s1745_s2, %s974_s15  ;;  %s1523_s12 = int_to_ptr.vmem [resolvable:$true] %s263_s12 }
  0x64   : > { %s1764_s13 = sand.u32 1, %s1311_s24   ;;  %s1203_s1 = scalar_lea.hbm %s1529_s10, 256 }
  0x65   : > { %s1533_s0 = scalar_lea.sflag [#allocation8], %s1764_s13  ;;  %p1204_p2 = scmp.ne.s32.totalorder %s1529_s10, %s1203_s1 }
  0x66   : > { %s1208_s16 = scalar_lea.hbm %s1745_s2, 512  ;;  %p1209_p0 = scmp.lt.u32.totalorder %s1529_s10, %s1745_s2 }
  0x67   : > { %p1206_p12 = pnand %p1204_p2, %p1175_p10  ;;  %p1210_p3 = scmp.lt.u32.totalorder %s1208_s16, %s1203_s1 }
  0x68   : > { %p1212_p9 = scmp.lt.u32.totalorder %s1203_s1, %s1529_s10 }
  0x69   : > { %p1207_p13 = pneg %p1206_p12  ;;  %p1211_p7 = por %p1210_p3, %p1209_p0 }
  0x6b   : > { %p1213_p1 = por %p1212_p9, %p1211_p7 }
  0x6d   : > { %p1214_p4 = pnand %p1213_p1, %p1207_p13 }
  0x6f   : > { %1217 = shalt.err (!%p1214_p4)
}
  0x70   : > { %s1218_s20 = scalar_lea.vmem %s1523_s12, 256  ;;  %s1318_s15 = smov [#allocation7]  }
  0x71   : > { %p1219_p6 = scmp.ne.s32.totalorder %s1523_s12, %s1218_s20  ;;  %s1223_s11 = sshll.u32 %s1318_s15, 4  ;;  %s1224_s11 = int_to_ptr.vmem [resolvable:$false] %s1223_s11 }
  0x72   : > { %s1225_s7 = scalar_lea.vmem %s1224_s11, 512  ;;  %p1226_p12 = scmp.lt.s32.totalorder %s1523_s12, %s1224_s11 }
  0x73   : > { %p1221_p8 = pnand %p1219_p6, %p1175_p10  ;;  %p1227_p0 = scmp.lt.s32.totalorder %s1225_s7, %s1218_s20 }
  0x75   : > { %p1222_p2 = pneg %p1221_p8  ;;  %p1228_p3 = por %p1227_p0, %p1226_p12 }
  0x77   : > { %p1229_p7 = pnand %p1228_p3, %p1222_p2 }
  0x79   : > { %1232 = shalt.err (!%p1229_p7)
}
  0x7a   : > { %s1319_s1 = smov 128   ;;  %s1320_s13 = smov 8  }
  0x7b   : > { %1049 = dma.hbm_to_vmem [thread:$0]  (!%p1489_p11), %s1529_s10, 256, %s1523_s12, %s1533_s0, %s1319_s1, %s1319_s1, %s1320_s13  }
  0x7c   : > { %p1765_p10 = scmp.ne.s32.totalorder %s1757_s29, 0 }
  0x7d   : > { %p1766_p13 = scmp.eq.s32.totalorder (!%p1765_p10), %s1384_s25, 0 }
  0x7e   : > { %275 = sbr.rel (%p1765_p10) target bundleno = 1316 (0x524), region = 44 }
  0x85   : > { %1278 = dma.done.wait (%p1766_p13), [#allocation5], 16   ;;  %p1767_p9 = pmov %p1766_p13 }
  0x86   : > { %s1566_s30 = sand.u32 1, %s1303_s22   ;;  %p1768_p11 = scmp.ne.s32.totalorder %s1755_s27, 0 }
  0x87   : > { %1280 = vsyncadd (%p1767_p9), [#allocation5], 4294967280  ;;  %s955_s14 = sshll.u32 %s1566_s30, 3  ;;  %s282_s16 = scalar_lea.sflag [#allocation3], %s1566_s30 }
  0x88   : > { %s1570_s18 = scalar_lea.vmem [#allocation6], %s955_s14 }
  0x89   : > { %1282 = dma.done.wait (%p1768_p11), %s282_s16, 128  }
  0x8a   : > { %1284 = vsyncadd (%p1768_p11), %s282_s16, 4294967168  ;;  %s290_s0 = sand.u32 1, %s1384_s25   ;;  %s956_s29 = sshll.u32 %s1566_s30, 4 }
  0x8b   : > { %s291_s17 = scalar_lea.sflag [#allocation8], %s290_s0  ;;  %s1578_s12 = scalar_lea.vmem [#allocation7], %s956_s29 }
  0x8c   : > { %1286 = dma.done.wait (%p1768_p11), %s291_s17, 256  }
  0x8d   : > { %1288 = vsyncadd (%p1768_p11), %s291_s17, 4294967040  ;;  %p1769_p1 = pmov %p1767_p9 }
  0x8f   : > { %1290 = dma.done.wait (%p1769_p1), [#allocation8], 1024   ;;  %p1770_p4 = pmov %p1769_p1 }
  0x91   : > { %1292 = vsyncadd (%p1770_p4), [#allocation8], 4294966272 }
  0x92   : > { %303 = sfence }
  0x93   : > { %v420_v0 = vld [vmem:[#allocation9 + $0x8] sm:$0xff]  ;;  %v421_v1 = vld [vmem:[#allocation9 + $0x18] sm:$0xff]  ;;  %vm344_vm0 = vcmask 261120   ;;  %v1589_v5 = vld [vmem:[%s1578_s12] sm:$0xff]  ;;  %v1321_v6 = vmov 0.0|0.0   ;;  %vm1322_vm1 = vmmov 0  }
  0x94   : > { %v422_v2 = vld [vmem:[#allocation9 + $0x28] sm:$0xff]  ;;  %v1014_v3 = vpack.c.bf16 %v421_v1, %v420_v0  ;;  %v423_v4 = vld [vmem:[#allocation9 + $0x38] sm:$0xff]  ;;  %1008 = vmatprep.subr.bf16.mxu0 %v1321_v6  ;;  %1005 = vmatprep.mubr.msk.f32.mxu1 %vm344_vm0, %v1589_v5  ;;  %v333_v8 = vld [vmem:[#allocation9] sm:$0xff]  ;;  %v1323_v11 = vmov 0.0   ;;  %s1324_s15 = smov 64   ;;  %s1325_s11 = smov 32  }
  0x95   : > { %v1018_v7 = vpack.c.bf16 %v423_v4, %v422_v2  ;;  %v334_v9 = vld [vmem:[#allocation9 + $0x10] sm:$0xff]  ;;  %v335_v10 = vld [vmem:[#allocation9 + $0x20] sm:$0xff]  ;;  %994 = vmatprep.mubr.msk.f32.mxu0 %vm1322_vm1, %v1323_v11  ;;  %v1594_v15 = vld [vmem:[%s1578_s12 + $0x8] sm:$0xff]  ;;  %s1326_s7 = smov 96   ;;  %vm547_vm2 = vcmask 785920   ;;  %vm684_vm3 = vcmask 1048320  }
  0x96   : > { %1015 = vmatprep.subr.bf16.mxu1 %v1014_v3  ;;  %v1009_v12 = vpack.c.bf16 %v334_v9, %v333_v8  ;;  %v336_v13 = vld [vmem:[#allocation9 + $0x30] sm:$0xff]  ;;  %v960_v17 = vld [vmem:[%s1747_s4 + $0x1] ss:$0 sm:$0xff]  ;;  %v958_v23 = vld [vmem:[%s1747_s4] ss:$0 sm:$0xff]  ;;  %s964_s14 = sld [smem:[#allocation2 + $0x1]] }
  0x97   : > { %1017 = vmatpush3.bf16.msra.mxu1 %v1014_v3  ;;  %v1012_v14 = vpack.c.bf16 %v336_v13, %v335_v10  ;;  %v1597_v16 = vld [vmem:[%s1570_s18] sm:$0xff]  ;;  %v1643_v63 = vld [vmem:[%s1748_s5] ss:$0 sm:$0xff]  ;;  %s969_s16 = sld [smem:[#allocation2 + $0x6]]  ;;  %s968_s18 = sld [smem:[#allocation2 + $0x5]]  ;;  %vm818_vm4 = vcmask 516096  }
  0x98   : > { %1019 = vmatprep.subr.bf16.mxu1 %v1018_v7  ;;  %1010 = vmatpush3.bf16.msra.mxu0 %v1009_v12  ;;  %s970_s0 = sld [smem:[#allocation2 + $0x7]]  ;;  %s524_s29 = sld [smem:[#allocation2]] }
  0x99   : > { %1011 = vmatprep.subr.bf16.mxu0 %v1321_v6  ;;  %s966_s17 = sld [smem:[#allocation2 + $0x3]]  ;;  %s965_s12 = sld [smem:[#allocation2 + $0x2]] }
  0x9a   : > { %s967_s27 = sld [smem:[#allocation2 + $0x4]]  ;;  %s971_s10 = sshll.u32 %s1384_s25, 4 }
  0x9b   : > { %1021 = vmatpush3.bf16.msra.mxu1 %v1018_v7  ;;  %s331_s19 = scalar_lea.vmem [#allocation10], %s1566_s30  ;;  %s821_s1 = scalar_lea.sflag [#allocation4], %s1566_s30 }
  0x9c   : > { %1013 = vmatpush3.bf16.msra.mxu0 %v1012_v14  ;;  %s833_s20 = sshll.u32 %s331_s19, 4  ;;  %s1327_s13 = smov [#allocation10]   ;;  %s1700_s20 = int_to_ptr.vmem [resolvable:$true] %s833_s20 }
  0x9d   : > { %s1233_s25 = scalar_lea.vmem %s1700_s20, 16 }
  0x9e   : > { %1006 = vmatmul.mubr.msk.f32.vlgmr.msra.gmra.mrb[0].mxu1 %vm344_vm0, %v1594_v15  ;;  %p1234_p6 = scmp.ne.s32.totalorder %s1700_s20, %s1233_s25 }
  0x9f   : > { %995 = vmatmul.mubr.msk.f32.vlgmr.msra.gmra.mrb[0].mxu0 %vm344_vm0, %v1597_v16 }
  0xa0   : > { %p1235_p8 = pnand %p1234_p6, %p1472_p5 }
  0xa2   : > { %p1236_p2 = pneg %p1235_p8 }
 0x171   : > { %v1007_v18 = vpop.f32.mrb[0].mxu1 }
 0x172   : > { %v503_v19 = vpop.f32.mrb[1].mxu1  ;;  %v414_v20 = vpop.f32.mrb[0].mxu0  ;;  %v1611_v24 = vadd.f32 %v1007_v18, %v960_v17 }
 0x173   : > { %v1606_v21 = vadd.f32 %v960_v17, %v503_v19  ;;  %v996_v22 = vpop.f32.mrb[1].mxu0  ;;  %v1615_v26 = vadd.f32 %v958_v23, %v414_v20 }
 0x174   : > { %v587_v27 = vmul.f32 %v1611_v24, %v1611_v24 }
 0x175   : > { %v586_v25 = vmul.f32 %v1606_v21, %v1606_v21  ;;  %v527_v28 = vmul.f32 %v1615_v26, %v1615_v26 }
 0x177   : > { %608 = vrot.lane.b32.xlu0 %v586_v25, %s1324_s15 }
 0x17b   : > { %610 = vrot.lane.b32.xlu0 %v587_v27, %s1324_s15 }
 0x17f   : > { %657 = vrot.lane.b32.xlu0 %v527_v28, %s1325_s11 }
 0x183   : > { %590 = vrot.lane.b32.xlu0 %v586_v25, %s1326_s7 }
 0x187   : > { %592 = vrot.lane.b32.xlu0 %v587_v27, %s1326_s7 }
 0x18b   : > { %666 = vrot.lane.b32.xlu0 %v586_v25, %s1325_s11 }
 0x18f   : > { %668 = vrot.lane.b32.xlu0 %v587_v27, %s1325_s11 }
 0x1e9   : > { %v609_v29 = vpop.permute.xlu0 %608 }
 0x1ea   : > { %v614_v32 = vsel %vm344_vm0, %v609_v29, 0.0  ;;  %v569_v29 = vmax.f32 %v1606_v21, 0.0 }
 0x1ed   : > { %v611_v30 = vpop.permute.xlu0 %610 }
 0x1ee   : > { %v617_v31 = vsel %vm344_vm0, %v611_v30, 0.0 }
 0x1ef   : > { %618 = vadd.xlane.f32.xlu1 %v617_v31 }
 0x1f1   : > { %v658_v33 = vpop.permute.xlu0 %657 }
 0x1f2   : > { %v660_v36 = vsel %vm344_vm0, %v658_v33, 0.0 }
 0x1f3   : > { %615 = vadd.xlane.f32.xlu1 %v614_v32 }
 0x1f5   : > { %v591_v34 = vpop.permute.xlu0 %590 }
 0x1f6   : > { %v596_v48 = vsel %vm344_vm0, %v591_v34, 0.0  ;;  %v570_v34 = vmax.f32 %v1611_v24, 0.0 }
 0x1f9   : > { %v593_v35 = vpop.permute.xlu0 %592 }
 0x1fa   : > { %v599_v38 = vsel %vm344_vm0, %v593_v35, 0.0 }
 0x1fd   : > { %v667_v37 = vpop.permute.xlu0 %666 }
 0x1fe   : > { %v672_v51 = vsel %vm344_vm0, %v667_v37, 0.0 }
 0x201   : > { %v669_v39 = vpop.permute.xlu0 %668 }
 0x202   : > { %v675_v40 = vsel %vm344_vm0, %v669_v39, 0.0 }
 0x204   : > { %538 = vrot.lane.b32.xlu1 %v527_v28, %s1324_s15 }
 0x228   : > { %661 = vadd.xlane.f32.xlu1 %v660_v36 }
 0x22c   : > { %600 = vadd.xlane.f32.xlu1 %v599_v38 }
 0x230   : > { %676 = vadd.xlane.f32.xlu1 %v675_v40 }
 0x27c   : > { %v619_v41 = vpop.xlane.xlu1 %618 }
 0x27d   : > { %v621_v42 = vmax.f32 %v619_v41, 1e-24 }
 0x27f   : > { %1104 = vrsqrt.f32 %v621_v42 }
 0x280   : > { %v616_v43 = vpop.xlane.xlu1 %615 }
 0x281   : > { %v620_v44 = vmax.f32 %v616_v43, 1e-24 }
 0x283   : > { %1106 = vrsqrt.f32 %v620_v44 }
 0x284   : > { %v539_v45 = vpop.permute.xlu1 %538 }
 0x285   : > { %v541_v46 = vsel %vm344_vm0, %v539_v45, 0.0 }
 0x286   : > { %542 = vadd.xlane.f32.xlu0 %v541_v46 }
 0x289   : > { %v1105_v47 = vpop.eup %1104 }
 0x28a   : > { %597 = vadd.xlane.f32.xlu0 %v596_v48  ;;  %v625_v49 = vmul.f32 %v1105_v47, %v1611_v24 }
 0x28c   : > { %v627_v54 = vsel %vm547_vm2, %v625_v49, 0.0 }
 0x28d   : > { %v1107_v50 = vpop.eup %1106 }
 0x28e   : > { %v624_v52 = vmul.f32 %v1107_v50, %v1606_v21  ;;  %673 = vadd.xlane.f32.xlu0 %v672_v51 }
 0x290   : > { %v626_v53 = vsel %vm547_vm2, %v624_v52, 0.0 }
 0x291   : > { %v628_v55 = vadd.f32 %v627_v54, %v626_v53 }
 0x293   : > { %v629_v56 = vrot.slane %v628_v55, 4 }
 0x295   : > { %v630_v57 = vadd.f32 %v629_v56, %v628_v55 }
 0x297   : > { %v631_v58 = vrot.slane %v630_v57, 2 }
 0x299   : > { %v632_v59 = vadd.f32 %v631_v58, %v630_v57 }
 0x29b   : > { %v633_v60 = vrot.slane %v632_v59, 1 }
 0x29d   : > { %v634_v61 = vadd.f32 %v633_v60, %v632_v59 }
 0x29f   : > { %v636_v62 = vmul.f32 0.0625, %v634_v61 }
 0x2a1   : > { %638 = vrot.lane.b32.xlu1 %v636_v62, %s1326_s7 }
 0x2a4   : > { %529 = vrot.lane.b32.xlu0 %v527_v28, %s1326_s7 }
 0x2a8   : > { %571 = vrot.lane.b32.xlu0 %v1643_v63, %s1326_s7 }
 0x2b5   : > { %v662_v0 = vpop.xlane.xlu1 %661 }
 0x2b6   : > { %v663_v1 = vmax.f32 %v662_v0, 1e-24 }
 0x2b8   : > { %1108 = vrsqrt.f32 %v663_v1 }
 0x2b9   : > { %v601_v4 = vpop.xlane.xlu1 %600 }
 0x2ba   : > { %v603_v33 = vmax.f32 %v601_v4, 1e-24 }
 0x2bd   : > { %v677_v8 = vpop.xlane.xlu1 %676 }
 0x2be   : > { %v679_v12 = vmax.f32 %v677_v8, 1e-24 }
 0x2c2   : > { %v1109_v2 = vpop.eup %1108 }
 0x2c3   : > { %v1648_v3 = vmul.f32 %v1109_v2, %v1615_v26 }
 0x2c5   : > { %v695_v6 = vsel %vm684_vm3, %v1648_v3, 0.0 }
 0x2c6   : > { %v696_v7 = vrot.slane %v695_v6, 4 }
 0x2c8   : > { %v697_v11 = vadd.f32 %v696_v7, %v695_v6 }
 0x2ca   : > { %v698_v14 = vrot.slane %v697_v11, 2 }
 0x2cc   : > { %v699_v19 = vadd.f32 %v698_v14, %v697_v11 }
 0x2ce   : > { %v700_v27 = vrot.slane %v699_v19, 1 }
 0x2d0   : > { %v701_v37 = vadd.f32 %v700_v27, %v699_v19 }
 0x2d2   : > { %v702_v44 = vmul.f32 0.125, %v701_v37  ;;  %v764_v37 = vstv %s968_s18 }
 0x313   : > { %v543_v9 = vpop.xlane.xlu0 %542  ;;  %v639_v56 = vpop.permute.xlu1 %638 }
 0x314   : > { %v544_v10 = vmax.f32 %v543_v9, 1e-24 }
 0x316   : > { %1110 = vrsqrt.f32 %v544_v10 }
 0x317   : > { %v598_v13 = vpop.xlane.xlu0 %597  ;;  %1112 = vrsqrt.f32 %v679_v12 }
 0x318   : > { %v602_v20 = vmax.f32 %v598_v13, 1e-24 }
 0x31b   : > { %v674_v17 = vpop.xlane.xlu0 %673 }
 0x31c   : > { %v678_v18 = vmax.f32 %v674_v17, 1e-24 }
 0x31e   : > { %1114 = vrsqrt.f32 %v678_v18 }
 0x31f   : > { %v530_v22 = vpop.permute.xlu0 %529  ;;  %1116 = vrsqrt.f32 %v602_v20 }
 0x320   : > { %v1111_v23 = vpop.eup %1110  ;;  %v532_v25 = vsel %vm344_vm0, %v530_v22, 0.0  ;;  %1118 = vrsqrt.f32 %v603_v33  ;;  %v583_v33 = vstv %s964_s14  ;;  %s1237_s14 = sshll.u32 %s1327_s13, 4  ;;  %s1238_s14 = int_to_ptr.vmem [resolvable:$false] %s1237_s14 }
 0x321   : > { %533 = vadd.xlane.f32.xlu1 %v532_v25  ;;  %v546_v28 = vmul.f32 %v1111_v23, %v1615_v26  ;;  %v1113_v32 = vpop.eup %1112  ;;  %p1240_p12 = scmp.lt.s32.totalorder %s1700_s20, %s1238_s14 }
 0x322   : > { %v683_v40 = vmul.f32 %v1113_v32, %v1611_v24 }
 0x323   : > { %v572_v30 = vpop.permute.xlu0 %571  ;;  %v548_v31 = vsel %vm547_vm2, %v546_v28, 0.0 }
 0x324   : > { %v574_v35 = vmul.f32 %v572_v30, %v569_v29  ;;  %v549_v36 = vrot.slane %v548_v31, 4  ;;  %v575_v38 = vmul.f32 %v572_v30, %v570_v34  ;;  %v686_v48 = vsel %vm684_vm3, %v683_v40, 0.0 }
 0x325   : > { %v712_v52 = vmul.f32 %v702_v44, %v683_v40 }
 0x326   : > { %v576_v39 = vsel %vm344_vm0, %v574_v35, 0.0  ;;  %v550_v41 = vadd.f32 %v549_v36, %v548_v31  ;;  %v579_v45 = vsel %vm344_vm0, %v575_v38, 0.0  ;;  %v768_v35 = vstv %s969_s16  ;;  %s1239_s16 = scalar_lea.vmem %s1238_s14, 32 }
 0x327   : > { %577 = vadd.xlane.f32.xlu1 %v576_v39  ;;  %p1241_p0 = scmp.lt.s32.totalorder %s1239_s16, %s1233_s25 }
 0x328   : > { %v1115_v42 = vpop.eup %1114  ;;  %v551_v49 = vrot.slane %v550_v41, 2 }
 0x329   : > { %v682_v43 = vmul.f32 %v1115_v42, %v1606_v21  ;;  %v1117_v50 = vpop.eup %1116  ;;  %v774_v42 = vstv %s970_s0  ;;  %p1242_p3 = por %p1241_p0, %p1240_p12 }
 0x32a   : > { %v606_v53 = vmul.f32 %v1117_v50, %v1606_v21  ;;  %v552_v54 = vadd.f32 %v551_v49, %v550_v41  ;;  %v1119_v55 = vpop.eup %1118  ;;  %v512_v21 = vmax.f32 %v1615_v26, 0.0 }
 0x32b   : > { %580 = vadd.xlane.f32.xlu1 %v579_v45  ;;  %v711_v46 = vmul.f32 %v702_v44, %v682_v43  ;;  %v685_v47 = vsel %vm684_vm3, %v682_v43, 0.0  ;;  %v607_v59 = vmul.f32 %v1119_v55, %v1611_v24  ;;  %p1243_p7 = pnand %p1242_p3, %p1236_p2 }
 0x32c   : > { %v687_v51 = vadd.f32 %v686_v48, %v685_v47  ;;  %v641_v57 = vmul.f32 %v639_v56, %v606_v53  ;;  %v553_v58 = vrot.slane %v552_v54, 1  ;;  %v520_v0 = vmul.f32 %v1643_v63, %v512_v21 }
 0x32d   : > { %715 = vrot.lane.b32.xlu0 %v711_v46, %s1325_s11  ;;  %v642_v60 = vmul.f32 %v639_v56, %v607_v59 }
 0x32e   : > { %v554_v61 = vadd.f32 %v553_v58, %v552_v54  ;;  %v521_v1 = vsel %vm344_vm0, %v520_v0, 0.0  ;;  %v688_v4 = vrot.slane %v687_v51, 4 }
 0x330   : > { %v556_v62 = vmul.f32 0.125, %v554_v61  ;;  %v689_v8 = vadd.f32 %v688_v4, %v687_v51 }
 0x331   : > { %717 = vrot.lane.b32.xlu0 %v712_v52, %s1325_s11 }
 0x332   : > { %v690_v11 = vrot.slane %v689_v8, 2 }
 0x334   : > { %v691_v13 = vadd.f32 %v690_v11, %v689_v8 }
 0x335   : > { %645 = vrot.lane.b32.xlu0 %v641_v57, %s1326_s7 }
 0x336   : > { %v692_v18 = vrot.slane %v691_v13, 1 }
 0x338   : > { %v693_v19 = vadd.f32 %v692_v18, %v691_v13 }
 0x339   : > { %647 = vrot.lane.b32.xlu0 %v642_v60, %s1326_s7 }
 0x33a   : > { %v694_v20 = vmul.f32 0.0625, %v693_v19 }
 0x33c   : > { %v703_v25 = vmul.f32 %v694_v20, %v1648_v3 }
 0x33d   : > { %558 = vrot.lane.b32.xlu0 %v556_v62, %s1326_s7 }
 0x35c   : > { %522 = vadd.xlane.f32.xlu0 %v521_v1 }
 0x39f   : > { %v716_v2 = vpop.permute.xlu0 %715 }
 0x3a0   : > { %v721_v24 = vsel %vm344_vm0, %v716_v2, 0.0 }
 0x3a1   : > { %722 = vadd.xlane.f32.xlu1 %v721_v24 }
 0x3a3   : > { %v718_v6 = vpop.permute.xlu0 %717 }
 0x3a4   : > { %v724_v7 = vsel %vm344_vm0, %v718_v6, 0.0 }
 0x3a5   : > { %725 = vadd.xlane.f32.xlu1 %v724_v7 }
 0x3a7   : > { %v646_v9 = vpop.permute.xlu0 %645 }
 0x3a8   : > { %v651_v10 = vsel %vm344_vm0, %v646_v9, 0.0 }
 0x3a9   : > { %652 = vadd.xlane.f32.xlu1 %v651_v10 }
 0x3ab   : > { %v648_v12 = vpop.permute.xlu0 %647 }
 0x3ac   : > { %v654_v63 = vsel %vm344_vm0, %v648_v12, 0.0 }
 0x3ad   : > { %655 = vadd.xlane.f32.xlu1 %v654_v63 }
 0x3ae   : > { %v534_v14 = vpop.xlane.xlu1 %533 }
 0x3af   : > { %v535_v17 = vmax.f32 %v534_v14, 1e-24  ;;  %v559_v27 = vpop.permute.xlu0 %558 }
 0x3b1   : > { %1120 = vrsqrt.f32 %v535_v17 }
 0x3b4   : > { %v578_v29 = vpop.xlane.xlu1 %577 }
 0x3b5   : > { %v584_v36 = vadd.f32 %v583_v33, %v578_v29  ;;  %v731_v29 = vstv %s966_s17 }
 0x3b7   : > { %v765_v41 = vmul.f32 %v764_v37, %v584_v36 }
 0x3b8   : > { %v581_v30 = vpop.xlane.xlu1 %580 }
 0x3b9   : > { %v585_v39 = vadd.f32 %v583_v33, %v581_v30 }
 0x3bb   : > { %v1121_v22 = vpop.eup %1120  ;;  %v766_v44 = vmul.f32 %v764_v37, %v585_v39 }
 0x3bc   : > { %v537_v23 = vmul.f32 %v1121_v22, %v1615_v26 }
 0x3be   : > { %v561_v28 = vmul.f32 %v559_v27, %v537_v23  ;;  %705 = vrot.lane.b32.xlu1 %v703_v25, %s1325_s11 }
 0x3c0   : > { %563 = vrot.lane.b32.xlu0 %v561_v28, %s1326_s7  ;;  %s1698_s7 = scalar_lea.hbm %s1749_s6, %s971_s10 }
 0x3e9   : > { %v1681_v31 = vpop.xlane.xlu0 %522 }
 0x42e   : > { %v723_v32 = vpop.xlane.xlu1 %722 }
 0x42f   : > { %v775_v47 = vmul.f32 %v774_v42, %v723_v32  ;;  %v728_v32 = vstv %s965_s12 }
 0x432   : > { %v726_v34 = vpop.xlane.xlu1 %725  ;;  %v564_v26 = vpop.permute.xlu0 %563 }
 0x433   : > { %v566_v3 = vsel %vm344_vm0, %v564_v26, 0.0  ;;  %v776_v48 = vmul.f32 %v774_v42, %v726_v34  ;;  %v735_v34 = vstv %s967_s27 }
 0x434   : > { %567 = vadd.xlane.f32.xlu1 %v566_v3 }
 0x436   : > { %v653_v38 = vpop.xlane.xlu1 %652 }
 0x437   : > { %v769_v40 = vmul.f32 %v768_v35, %v653_v38 }
 0x439   : > { %v771_v45 = vadd.f32 %v769_v40, %v765_v41 }
 0x43a   : > { %v656_v43 = vpop.xlane.xlu1 %655 }
 0x43b   : > { %v770_v46 = vmul.f32 %v768_v35, %v656_v43  ;;  %v777_v51 = vadd.f32 %v775_v47, %v771_v45 }
 0x43d   : > { %v772_v49 = vadd.f32 %v770_v46, %v766_v44 }
 0x43e   : > { %v706_v50 = vpop.permute.xlu1 %705 }
 0x43f   : > { %v778_v52 = vadd.f32 %v776_v48, %v772_v49  ;;  %v708_v53 = vsel %vm344_vm0, %v706_v50, 0.0 }
 0x440   : > { %709 = vadd.xlane.f32.xlu0 %v708_v53 }
 0x441   : > { %v779_v54 = vmax.f32 %v777_v51, %v778_v52 }
 0x443   : > { %v780_v55 = vrot.slane %v779_v54, 4 }
 0x445   : > { %v781_v56 = vmax.f32 %v779_v54, %v780_v55 }
 0x447   : > { %v782_v57 = vrot.slane %v781_v56, 2 }
 0x449   : > { %v783_v58 = vmax.f32 %v781_v56, %v782_v57 }
 0x44b   : > { %v784_v59 = vrot.slane %v783_v58, 1 }
 0x44d   : > { %v785_v60 = vmax.f32 %v783_v58, %v784_v59 }
 0x44f   : > { %v786_v61 = vsub.f32 %v777_v51, %v785_v60  ;;  %v787_v62 = vsub.f32 %v778_v52, %v785_v60 }
 0x451   : > { %v788_v21 = vmul.f32 1.442695, %v786_v61  ;;  %v790_v0 = vmul.f32 1.442695, %v787_v62 }
 0x453   : > { %1122 = vpow2.f32 %v788_v21 }
 0x454   : > { %1124 = vpow2.f32 %v790_v0 }
 0x45d   : > { %v1123_v1 = vpop.eup %1122 }
 0x45e   : > { %v1125_v2 = vpop.eup %1124 }
 0x45f   : > { %v792_v4 = vadd.f32 %v1125_v2, %v1123_v1 }
 0x461   : > { %v793_v24 = vrot.slane %v792_v4, 4 }
 0x463   : > { %v794_v6 = vadd.f32 %v793_v24, %v792_v4 }
 0x465   : > { %v795_v7 = vrot.slane %v794_v6, 2 }
 0x467   : > { %v796_v8 = vadd.f32 %v795_v7, %v794_v6 }
 0x469   : > { %v797_v9 = vrot.slane %v796_v8, 1 }
 0x46b   : > { %v798_v10 = vadd.f32 %v797_v9, %v796_v8 }
 0x46d   : > { %1126 = vrcp.f32 %v798_v10 }
 0x477   : > { %v1127_v11 = vpop.eup %1126 }
 0x478   : > { %v800_v12 = vmul.f32 %v1127_v11, %v1123_v1  ;;  %v801_v63 = vmul.f32 %v1127_v11, %v1125_v2 }
 0x47a   : > { %v802_v13 = vmul.f32 %v800_v12, %v1589_v5  ;;  %v803_v14 = vmul.f32 %v801_v63, %v1594_v15  ;;  %v525_v5 = vstv %s524_s29 }
 0x47b   : > { %v526_v30 = vadd.f32 %v525_v5, %v1681_v31 }
 0x47c   : > { %v804_v17 = vsel %vm344_vm0, %v802_v13, 0.0  ;;  %v805_v18 = vsel %vm344_vm0, %v803_v14, 0.0 }
 0x47d   : > { %v806_v19 = vadd.f32 %v805_v18, %v804_v17  ;;  %v729_v26 = vmul.f32 %v728_v32, %v526_v30 }
 0x47f   : > { %v807_v20 = vrot.slane %v806_v19, 4 }
 0x481   : > { %v808_v22 = vadd.f32 %v807_v20, %v806_v19 }
 0x483   : > { %v809_v23 = vrot.slane %v808_v22, 2 }
 0x485   : > { %v810_v25 = vadd.f32 %v809_v23, %v808_v22 }
 0x487   : > { %v811_v27 = vrot.slane %v810_v25, 1 }
 0x489   : > { %v812_v28 = vadd.f32 %v811_v27, %v810_v25 }
 0x48b   : > { %814 = vrot.lane.b32.xlu0 %v812_v28, %s1325_s11 }
 0x4c1   : > { %v568_v15 = vpop.xlane.xlu1 %567 }
 0x4c2   : > { %v732_v33 = vmul.f32 %v731_v29, %v568_v15 }
 0x4c4   : > { %v733_v35 = vadd.f32 %v732_v33, %v729_v26 }
 0x4cd   : > { %v710_v3 = vpop.xlane.xlu0 %709 }
 0x4ce   : > { %v736_v36 = vmul.f32 %v735_v34, %v710_v3 }
 0x4d0   : > { %v737_v37 = vadd.f32 %v736_v36, %v733_v35 }
 0x4d2   : > { %v738_v38 = vrot.slane %v737_v37, 4 }
 0x4d4   : > { %v739_v39 = vmax.f32 %v737_v37, %v738_v38 }
 0x4d6   : > { %v740_v40 = vrot.slane %v739_v39, 2 }
 0x4d8   : > { %v741_v41 = vmax.f32 %v739_v39, %v740_v40 }
 0x4da   : > { %v742_v42 = vrot.slane %v741_v41, 1 }
 0x4dc   : > { %v743_v43 = vmax.f32 %v741_v41, %v742_v42 }
 0x4de   : > { %v744_v44 = vsub.f32 %v737_v37, %v743_v43 }
 0x4e0   : > { %v745_v45 = vmul.f32 1.442695, %v744_v44 }
 0x4e2   : > { %1128 = vpow2.f32 %v745_v45 }
 0x4ec   : > { %v1129_v46 = vpop.eup %1128 }
 0x4ed   : > { %v747_v47 = vrot.slane %v1129_v46, 4 }
 0x4ef   : > { %v748_v31 = vadd.f32 %v1129_v46, %v747_v47 }
 0x4f1   : > { %v749_v48 = vrot.slane %v748_v31, 2 }
 0x4f3   : > { %v750_v49 = vadd.f32 %v749_v48, %v748_v31 }
 0x4f5   : > { %v751_v50 = vrot.slane %v750_v49, 1 }
 0x4f7   : > { %v752_v51 = vadd.f32 %v751_v50, %v750_v49 }
 0x4f9   : > { %1130 = vrcp.f32 %v752_v51 }
 0x4fd   : > { %v815_v62 = vpop.permute.xlu0 %814 }
 0x503   : > { %v1131_v52 = vpop.eup %1130 }
 0x504   : > { %v754_v53 = vmul.f32 %v1131_v52, %v1129_v46 }
 0x506   : > { %v755_v54 = vmul.f32 %v754_v53, %v1597_v16 }
 0x508   : > { %v756_v55 = vsel %vm344_vm0, %v755_v54, 0.0 }
 0x509   : > { %v757_v56 = vrot.slane %v756_v55, 4 }
 0x50b   : > { %v758_v57 = vadd.f32 %v757_v56, %v756_v55 }
 0x50d   : > { %v759_v58 = vrot.slane %v758_v57, 2 }
 0x50f   : > { %v760_v59 = vadd.f32 %v759_v58, %v758_v57 }
 0x511   : > { %v761_v60 = vrot.slane %v760_v59, 1 }
 0x513   : > { %v762_v61 = vadd.f32 %v761_v60, %v760_v59 }
 0x515   : > { %v817_v16 = vsel %vm344_vm0, %v762_v61, %v815_v62 }
 0x516   : > { %819 = vst.msk [vmem:[%s331_s19] sm:$0x1] %vm818_vm4, %v817_v16 }
 0x517   : > { %1246 = shalt.err (!%p1243_p7)
}
 0x518   : > { %s1247_s30 = scalar_lea.hbm %s1698_s7, 16  ;;  %s1251_s29 = scalar_lea.hbm %s1749_s6, 32 }
 0x519   : > { %p1248_p10 = scmp.ne.s32.totalorder %s1698_s7, %s1247_s30  ;;  %p1252_p11 = scmp.lt.u32.totalorder %s1698_s7, %s1749_s6 }
 0x51a   : > { %p1253_p1 = scmp.lt.u32.totalorder %s1251_s29, %s1247_s30  ;;  %p1255_p6 = scmp.lt.u32.totalorder %s1247_s30, %s1698_s7 }
 0x51b   : > { %p1249_p13 = pnand %p1248_p10, %p1472_p5 }
 0x51c   : > { %p1254_p4 = por %p1253_p1, %p1252_p11 }
 0x51d   : > { %p1250_p9 = pneg %p1249_p13 }
 0x51e   : > { %p1256_p8 = por %p1255_p6, %p1254_p4 }
 0x520   : > { %p1257_p2 = pnand %p1256_p8, %p1250_p9 }
 0x522   : > { %1260 = shalt.err (!%p1257_p2)
}
 0x523   : > { %1034 = dma.vmem_to_hbm [thread:$0]  (%p1472_p5), %s1700_s20, 16, %s1698_s7, %s821_s1  }
 0x524 PF: > { %s845_s27 = sand.u32 1, %s1299_s21   ;;  %p1771_p12 = scmp.ne.s32.totalorder %s1756_s28, 0 }
 0x525   : > { %p1772_p0 = scmp.ge.s32.totalorder %s1311_s24, 2  ;;  %s846_s10 = scalar_lea.sflag [#allocation4], %s845_s27 }
 0x527   : > { %p1051_p3 = pnand %p1772_p0, %p1771_p12 }
 0x529   : > { %1294 = dma.done.wait (!%p1051_p3), %s846_s10, 16  }
 0x52a   : > { %1296 = vsyncadd (!%p1051_p3), %s846_s10, 4294967280  ;;  %p23_p7 = scmp.ge.s32.totalorder %s1417_s9, 4   ;;  %s1773_s21 = smov %s1303_s22 }
 0x52b   : > { %s1774_s22 = smov %s1307_s23  ;;  %s1775_s23 = smov %s1468_s8 }
 0x52c   : > { %s1776_s24 = smov %s1417_s9  ;;  %25 = sbr.rel (!%p23_p7) target bundleno = 11 (0xb), region = 111 }
 0x533   :  { %850 = vsyncpa [#allocation3], 1 }
 0x534   :  { %852 = vsyncpa [#allocation3 + $0x1], 1 }
 0x535   :  { %853 = vsyncpa [#allocation8], 1 }
 0x536   :  { %855 = vsyncpa [#allocation8 + $0x1], 1 }
 0x537   :  { %856 = vsyncpa [#allocation4], 1 }
 0x538   :  { %858 = vsyncpa [#allocation4 + $0x1], 1 }
 0x539   :  { %859 = vsyncpa [#allocation5], 1 }
 0x53a   :  { %861 = vsyncpa [#allocation5 + $0x1], 1 }

</bundles_post_ra>
